<compile_context>
chip_gen: v7x
topology: tpu7x:2x2x1
jax: 0.10.0
libtpu: 0.0.40
codegen_flags: <defaults>
</compile_context>

<pallas_src>
import functools

import jax
import jax.numpy as jnp
from jax.experimental import pallas as pl
from jax.experimental.pallas import tpu as pltpu


def _round_up(x, n):
    return (x + n - 1) // n * n


def _vmem_budget_bytes():
    """~75% of physical per-core VMEM (96 MiB on v5e/v6e, 48 MiB on v7x)."""
    try:
        cap = int(pltpu.get_tpu_info().vmem_capacity_bytes)
    except Exception:
        cap = 64 * 1024 * 1024  # conservative fallback: v7x per-TC VMEM
    return (cap * 3) // 4


def _choose_tile_h(d_in_p, hidden_p, d_out_p, tm, x_bytes, out_bytes, budget):
    """Largest H tile (multiple of 128 dividing hidden_p) whose estimated
    VMEM footprint fits the budget."""
    q = hidden_p // 128

    def fits(th):
        nk = hidden_p // th
        wbuf = 1 if nk == 1 else 2  # weight pipeline depth
        est = (2 * tm * d_in_p * x_bytes            # x tiles (double buffered)
               + 2 * tm * d_out_p * out_bytes       # out tiles (double buffered)
               + tm * d_out_p * 4                   # f32 accumulator scratch
               + tm * d_in_p * 2                    # bf16 xn scratch
               + wbuf * (d_in_p * th + th * d_out_p) * 2   # bf16 weight tiles
               + wbuf * th * 4                      # b1 tile
               + (2 * d_in_p + d_out_p) * 4         # gamma/beta/b2
               + tm * th * (4 + 2))                 # h intermediate (f32 + bf16)
        return est <= 0.9 * budget

    for d in range(q, 0, -1):
        if q % d == 0 and fits(128 * d):
            return 128 * d
    return 128


def _mlp_kernel(x_ref, gamma_ref, beta_ref, w1_ref, b1_ref, w2_ref, b2_ref,
                o_ref, acc_ref, xn_ref, *, eps, use_residual, n_features):
    k = pl.program_id(1)
    d_in_p = x_ref.shape[-1]

    # ---- LayerNorm once per row tile (k == 0), cache bf16 result ----
    @pl.when(k == 0)
    def _():
        x = x_ref[...].astype(jnp.float32)                    # (tm, Dp)
        inv_n = 1.0 / n_features
        mean = jnp.sum(x, axis=-1, keepdims=True) * inv_n     # pad lanes are 0
        xc = x - mean
        if n_features != d_in_p:
            lane = jax.lax.broadcasted_iota(jnp.int32, xc.shape, 1)
            xc_m = jnp.where(lane < n_features, xc, 0.0)
        else:
            xc_m = xc
        var = jnp.sum(xc_m * xc_m, axis=-1, keepdims=True) * inv_n
        xn = xc * jax.lax.rsqrt(var + eps)
        # gamma/beta are zero-padded -> padded lanes of xn become exactly 0.
        xn = xn * gamma_ref[...] + beta_ref[...]
        xn_ref[...] = xn.astype(jnp.bfloat16)
        acc_ref[...] = jnp.zeros_like(acc_ref)

    # ---- fc1 chunk (bf16 MXU, f32 acc) + exact-erf GELU ----
    h = jnp.dot(xn_ref[...], w1_ref[...],
                preferred_element_type=jnp.float32)            # (tm, tH)
    h = h + b1_ref[...]
    h = 0.5 * h * (1.0 + jax.lax.erf(h * 0.7071067811865476))

    # ---- fc2 chunk accumulated into f32 scratch ----
    acc_ref[...] += jnp.dot(h.astype(jnp.bfloat16), w2_ref[...],
                            preferred_element_type=jnp.float32)  # (tm, Dout_p)

    # ---- finalize: bias + residual + store ----
    @pl.when(k == pl.num_programs(1) - 1)
    def _():
        y = acc_ref[...] + b2_ref[...]
        if use_residual:
            y = y + x_ref[...].astype(jnp.float32)
        o_ref[...] = y.astype(o_ref.dtype)


def prepare_mlp_params(params, *, lane_multiple=128, weight_dtype=jnp.bfloat16):
    """Hoisted, cacheable weight layout: transpose + zero-pad to lane multiples
    + bf16 cast.  Call once and reuse across mlp_pallas invocations.
    (On v6e/v7x, lane_multiple=256 fills the 256x256 MXU when the real dims
    aren't already multiples of 256.)"""
    gamma, beta = params["ln_w"], params["ln_b"]
    w1_t, b1 = params["fc1_w"], params["fc1_b"]               # (H, D_in), (H,)
    w2_t, b2 = params["fc2_w"], params["fc2_b"]               # (D_out, H), (D_out,)
    d_in = gamma.shape[0]
    hidden, d_out = w1_t.shape[0], w2_t.shape[0]
    d_in_p = _round_up(d_in, lane_multiple)
    hidden_p = _round_up(hidden, lane_multiple)
    d_out_p = _round_up(d_out, lane_multiple)
    f32 = jnp.float32
    return {
        "gamma": jnp.pad(gamma.astype(f32), (0, d_in_p - d_in)).reshape(1, d_in_p),
        "beta": jnp.pad(beta.astype(f32), (0, d_in_p - d_in)).reshape(1, d_in_p),
        "b1": jnp.pad(b1.astype(f32), (0, hidden_p - hidden)).reshape(1, hidden_p),
        "b2": jnp.pad(b2.astype(f32), (0, d_out_p - d_out)).reshape(1, d_out_p),
        "w1": jnp.pad(jnp.transpose(w1_t),
                      ((0, d_in_p - d_in), (0, hidden_p - hidden))).astype(weight_dtype),
        "w2": jnp.pad(jnp.transpose(w2_t),
                      ((0, hidden_p - hidden), (0, d_out_p - d_out))).astype(weight_dtype),
        "dims": (d_in, hidden, d_out),
    }


def mlp_pallas(x, params, *, use_residual=True, eps=1e-5, tile_m=None,
               out_dtype=None):
    """x: (batch, seq, in_dim).  `params` is either the raw PyTorch-convention
    dict or the output of prepare_mlp_params (preferred for repeated calls)."""
    if "dims" not in params:
        params = prepare_mlp_params(params)
    d_in, hidden, d_out = params["dims"]
    gamma2, beta2 = params["gamma"], params["beta"]
    w1, b1_2 = params["w1"], params["b1"]
    w2, b2_2 = params["w2"], params["b2"]
    d_in_p, hidden_p, d_out_p = gamma2.shape[-1], w1.shape[-1], w2.shape[-1]

    b, s, d_in_x = x.shape
    assert d_in_x == d_in
    if use_residual:
        assert d_in == d_out
    out_dtype = x.dtype if out_dtype is None else out_dtype

    budget = _vmem_budget_bytes()
    if tile_m is None:
        # v5e/v6e (128 MiB VMEM): bigger row tiles amortize per-step overhead;
        # v7x (64 MiB): stay at 256.
        tile_m = 512 if budget >= 72 * 1024 * 1024 else 256

    m = b * s
    tm = max(8, min(tile_m, _round_up(m, 8)))
    m_p = _round_up(m, tm)
    num_i = m_p // tm

    x_bytes = jnp.dtype(x.dtype).itemsize
    out_bytes = jnp.dtype(out_dtype).itemsize
    t_h = _choose_tile_h(d_in_p, hidden_p, d_out_p, tm, x_bytes, out_bytes, budget)
    num_k = hidden_p // t_h

    xf = x.reshape(m, d_in)
    if m_p != m or d_in_p != d_in:
        # TODO(synk): handle the ragged M tail in-kernel instead of padding.
        xf = jnp.pad(xf, ((0, m_p - m), (0, d_in_p - d_in)))

    kernel = functools.partial(_mlp_kernel, eps=eps,
                               use_residual=use_residual, n_features=d_in)

    weight_bytes = (d_in_p * hidden_p + hidden_p * d_out_p) * 2
    cost = pl.CostEstimate(
        flops=2 * m_p * hidden_p * (d_in_p + d_out_p),
        transcendentals=m_p * hidden_p,
        bytes_accessed=(m_p * d_in_p * x_bytes
                        + m_p * d_out_p * out_bytes
                        + weight_bytes * (num_i if num_k > 1 else 1)
                        + (2 * d_in_p + hidden_p + d_out_p) * 4))

    def build(use_single_buffer):
        # Single-buffer operands whose block index never changes across the
        # grid (halves resident weight footprint when everything fits VMEM).
        mode_const = pl.Buffered(1) if use_single_buffer else None
        mode_w = pl.Buffered(1) if (use_single_buffer and num_k == 1) else None

        def bs(shape, imap, mode=None):
            if mode is None:
                return pl.BlockSpec(shape, imap)
            return pl.BlockSpec(shape, imap, pipeline_mode=mode)

        return pl.pallas_call(
            kernel,
            out_shape=jax.ShapeDtypeStruct((m_p, d_out_p), out_dtype),
            grid_spec=pltpu.PrefetchScalarGridSpec(
                num_scalar_prefetch=0,
                grid=(num_i, num_k),
                in_specs=[
                    bs((tm, d_in_p), lambda i, k: (i, 0)),              # x
                    bs((1, d_in_p), lambda i, k: (0, 0), mode_const),   # gamma
                    bs((1, d_in_p), lambda i, k: (0, 0), mode_const),   # beta
                    bs((d_in_p, t_h), lambda i, k: (0, k), mode_w),     # w1 (bf16)
                    bs((1, t_h), lambda i, k: (0, k), mode_w),          # b1
                    bs((t_h, d_out_p), lambda i, k: (k, 0), mode_w),    # w2 (bf16)
                    bs((1, d_out_p), lambda i, k: (0, 0), mode_const),  # b2
                ],
                out_specs=pl.BlockSpec((tm, d_out_p), lambda i, k: (i, 0)),
                scratch_shapes=[
                    pltpu.VMEM((tm, d_out_p), jnp.float32),   # fc2 accumulator
                    pltpu.VMEM((tm, d_in_p), jnp.bfloat16),   # cached LN output
                ],
            ),
            compiler_params=pltpu.CompilerParams(
                dimension_semantics=("parallel", "arbitrary"),
                vmem_limit_bytes=budget,
            ),
            cost_estimate=cost,
        )

    args = (xf, gamma2, beta2, w1, b1_2, w2, b2_2)
    try:
        out = build(True)(*args)
    except Exception:
        # Conservative fallback if Buffered(1) is unsupported on this toolchain.
        out = build(False)(*args)

    if m_p != m or d_out_p != d_out:
        out = out[:m, :d_out]
    return out.reshape(b, s, d_out)


def init_params(key, in_dim, out_dim, hidden_dim):
    """Deterministic synthetic init (PyTorch Linear weight shape conventions)."""
    k1, k2, k3, k4 = jax.random.split(key, 4)
    scale1 = 1.0 / jnp.sqrt(in_dim)
    scale2 = 1.0 / jnp.sqrt(hidden_dim)
    return {
        "ln_w": jnp.ones((in_dim,), jnp.float32),
        "ln_b": jnp.zeros((in_dim,), jnp.float32),
        "fc1_w": jax.random.uniform(k1, (hidden_dim, in_dim), jnp.float32,
                                    -scale1, scale1),
        "fc1_b": jax.random.uniform(k2, (hidden_dim,), jnp.float32,
                                    -scale1, scale1),
        "fc2_w": jax.random.uniform(k3, (out_dim, hidden_dim), jnp.float32,
                                    -scale2, scale2),
        "fc2_b": jax.random.uniform(k4, (out_dim,), jnp.float32,
                                    -scale2, scale2),
    }


def mlp_reference(x, params, *, use_residual=True, eps=1e-5):
    """Pure-JAX f32 reference mirroring the PyTorch forward."""
    residual = x
    mean = jnp.mean(x, axis=-1, keepdims=True)
    var = jnp.mean((x - mean) ** 2, axis=-1, keepdims=True)
    xn = (x - mean) / jnp.sqrt(var + eps)
    xn = xn * params["ln_w"] + params["ln_b"]
    h = xn @ params["fc1_w"].T + params["fc1_b"]
    h = 0.5 * h * (1.0 + jax.lax.erf(h / jnp.sqrt(2.0)))
    y = h @ params["fc2_w"].T + params["fc2_b"]
    if use_residual:
        y = y + residual
    return y


if __name__ == "__main__":
    batch, seq, in_dim, hidden_dim = 2, 8, 32, 64
    out_dim = in_dim  # use_residual=True requires in_dim == out_dim

    key = jax.random.PRNGKey(0)
    kx, kp = jax.random.split(key)
    x = jax.random.normal(kx, (batch, seq, in_dim), jnp.float32)
    params = init_params(kp, in_dim, out_dim, hidden_dim)

    # Weight layout is prepared once and reused (hoisted out of the hot path).
    prepared = prepare_mlp_params(params)

    out = mlp_pallas(x, prepared, use_residual=True)
    out = jax.block_until_ready(out)

    ref = mlp_reference(x, params, use_residual=True)
    assert out.shape == (batch, seq, out_dim)
    # bf16 MXU operands -> compare against the f32 reference with a looser tol.
    assert jnp.allclose(out, ref, atol=2e-2, rtol=2e-2), (
        "mismatch vs reference, max abs diff = %g"
        % float(jnp.max(jnp.abs(out - ref))))

    print("KERNEL_OK")
</pallas_src>

<mosaic_0001>
module attributes {stable_mosaic.version = 11 : i64} {
  func.func @_mlp_kernel(%arg0: i32, %arg1: i32, %arg2: memref<16x128xf32, #tpu.memory_space<vmem>>, %arg3: memref<1x128xf32, #tpu.memory_space<vmem>>, %arg4: memref<1x128xf32, #tpu.memory_space<vmem>>, %arg5: memref<128x128xbf16, #tpu.memory_space<vmem>>, %arg6: memref<1x128xf32, #tpu.memory_space<vmem>>, %arg7: memref<128x128xbf16, #tpu.memory_space<vmem>>, %arg8: memref<1x128xf32, #tpu.memory_space<vmem>>, %arg9: memref<16x128xf32, #tpu.memory_space<vmem>>, %arg10: memref<16x128xf32, #tpu.memory_space<vmem>>, %arg11: memref<16x128xbf16, #tpu.memory_space<vmem>>) attributes {dimension_semantics = [#tpu.dimension_semantics<parallel>, #tpu.dimension_semantics<arbitrary>], iteration_bounds = array<i64: 1, 1>, scalar_prefetch = 0 : i64, scratch_operands = 2 : i64, tpu.core_type = #tpu.core_type<tc>, window_params = [{transform_indices = @transform_0, window_bounds = array<i64: 16, 128>}, {pipeline_mode = #tpu.pipeline_mode<synchronous>, transform_indices = @transform_1, window_bounds = array<i64: 1, 128>}, {pipeline_mode = #tpu.pipeline_mode<synchronous>, transform_indices = @transform_2, window_bounds = array<i64: 1, 128>}, {pipeline_mode = #tpu.pipeline_mode<synchronous>, transform_indices = @transform_3, window_bounds = array<i64: 128, 128>}, {pipeline_mode = #tpu.pipeline_mode<synchronous>, transform_indices = @transform_4, window_bounds = array<i64: 1, 128>}, {pipeline_mode = #tpu.pipeline_mode<synchronous>, transform_indices = @transform_5, window_bounds = array<i64: 128, 128>}, {pipeline_mode = #tpu.pipeline_mode<synchronous>, transform_indices = @transform_6, window_bounds = array<i64: 1, 128>}, {transform_indices = @transform_7, window_bounds = array<i64: 16, 128>}]} {
    %c0_i32 = arith.constant 0 : i32
    %0 = arith.cmpi eq, %arg1, %c0_i32 : i32
    %1 = arith.extui %0 : i1 to i32
    %c0_i32_0 = arith.constant 0 : i32
    %2 = arith.cmpi ne, %1, %c0_i32_0 : i32
    scf.if %2 {
      %c0_18 = arith.constant 0 : index
      %c0_19 = arith.constant 0 : index
      %26 = vector.load %arg2[%c0_18, %c0_19] : memref<16x128xf32, #tpu.memory_space<vmem>>, vector<16x128xf32>
      %cst_20 = arith.constant dense<0.000000e+00> : vector<16xf32>
      %27 = vector.multi_reduction <add>, %26, %cst_20 [1] : vector<16x128xf32> to vector<16xf32>
      %28 = vector.shape_cast %27 : vector<16xf32> to vector<16x1xf32>
      %cst_21 = arith.constant 3.125000e-02 : f32
      %29 = vector.broadcast %cst_21 : f32 to vector<16x1xf32>
      %30 = arith.mulf %28, %29 : vector<16x1xf32>
      %31 = vector.broadcast %30 : vector<16x1xf32> to vector<16x128xf32>
      %32 = arith.subf %26, %31 : vector<16x128xf32>
      %33 = tpu.iota {dimensions = array<i32: 1>} : vector<16x128xi32>
      %c32_i32 = arith.constant 32 : i32
      %34 = vector.broadcast %c32_i32 : i32 to vector<16x128xi32>
      %35 = arith.cmpi slt, %33, %34 : vector<16x128xi32>
      %cst_22 = arith.constant 0.000000e+00 : f32
      %36 = vector.broadcast %cst_22 : f32 to vector<16x128xf32>
      %37 = arith.select %35, %32, %36 : vector<16x128xi1>, vector<16x128xf32>
      %38 = arith.mulf %37, %37 : vector<16x128xf32>
      %cst_23 = arith.constant dense<0.000000e+00> : vector<16xf32>
      %39 = vector.multi_reduction <add>, %38, %cst_23 [1] : vector<16x128xf32> to vector<16xf32>
      %40 = vector.shape_cast %39 : vector<16xf32> to vector<16x1xf32>
      %cst_24 = arith.constant 3.125000e-02 : f32
      %41 = vector.broadcast %cst_24 : f32 to vector<16x1xf32>
      %42 = arith.mulf %40, %41 : vector<16x1xf32>
      %cst_25 = arith.constant 9.99999974E-6 : f32
      %43 = vector.broadcast %cst_25 : f32 to vector<16x1xf32>
      %44 = arith.addf %42, %43 : vector<16x1xf32>
      %45 = math.rsqrt %44 : vector<16x1xf32>
      %46 = vector.broadcast %45 : vector<16x1xf32> to vector<16x128xf32>
      %47 = arith.mulf %32, %46 : vector<16x128xf32>
      %c0_26 = arith.constant 0 : index
      %c0_27 = arith.constant 0 : index
      %48 = vector.load %arg3[%c0_26, %c0_27] : memref<1x128xf32, #tpu.memory_space<vmem>>, vector<1x128xf32>
      %49 = vector.broadcast %48 : vector<1x128xf32> to vector<16x128xf32>
      %50 = arith.mulf %47, %49 : vector<16x128xf32>
      %c0_28 = arith.constant 0 : index
      %c0_29 = arith.constant 0 : index
      %51 = vector.load %arg4[%c0_28, %c0_29] : memref<1x128xf32, #tpu.memory_space<vmem>>, vector<1x128xf32>
      %52 = vector.broadcast %51 : vector<1x128xf32> to vector<16x128xf32>
      %53 = arith.addf %50, %52 : vector<16x128xf32>
      %54 = arith.truncf %53 : vector<16x128xf32> to vector<16x128xbf16>
      %c0_30 = arith.constant 0 : index
      %c0_31 = arith.constant 0 : index
      %55 = vector.load %arg11[%c0_30, %c0_31] : memref<16x128xbf16, #tpu.memory_space<vmem>>, vector<16x128xbf16>
      tpu.vector_store %arg11[%c0_30, %c0_31], %54 {strides = array<i32>} : memref<16x128xbf16, #tpu.memory_space<vmem>>, vector<16x128xbf16>,
      %cst_32 = arith.constant 0.000000e+00 : f32
      %56 = vector.broadcast %cst_32 : f32 to vector<16x128xf32>
      %c0_33 = arith.constant 0 : index
      %c0_34 = arith.constant 0 : index
      %57 = vector.load %arg10[%c0_33, %c0_34] : memref<16x128xf32, #tpu.memory_space<vmem>>, vector<16x128xf32>
      tpu.vector_store %arg10[%c0_33, %c0_34], %56 {strides = array<i32>} : memref<16x128xf32, #tpu.memory_space<vmem>>, vector<16x128xf32>,
    } else {
    }
    %c0 = arith.constant 0 : index
    %c0_1 = arith.constant 0 : index
    %3 = vector.load %arg11[%c0, %c0_1] : memref<16x128xbf16, #tpu.memory_space<vmem>>, vector<16x128xbf16>
    %c0_2 = arith.constant 0 : index
    %c0_3 = arith.constant 0 : index
    %4 = vector.load %arg5[%c0_2, %c0_3] : memref<128x128xbf16, #tpu.memory_space<vmem>>, vector<128x128xbf16>
    %cst = arith.constant dense<0.000000e+00> : vector<16x128xf32>
    %5 = tpu.matmul %3, %4, %cst {dimension_numbers = #tpu.dot_dimension_numbers<[1], [0], [0], [1], [0, 0, 1, 1], [], []>} : vector<16x128xbf16>, vector<128x128xbf16>, vector<16x128xf32> -> vector<16x128xf32>
    %c0_4 = arith.constant 0 : index
    %c0_5 = arith.constant 0 : index
    %6 = vector.load %arg6[%c0_4, %c0_5] : memref<1x128xf32, #tpu.memory_space<vmem>>, vector<1x128xf32>
    %7 = vector.broadcast %6 : vector<1x128xf32> to vector<16x128xf32>
    %8 = arith.addf %5, %7 : vector<16x128xf32>
    %cst_6 = arith.constant 5.000000e-01 : f32
    %9 = vector.broadcast %cst_6 : f32 to vector<16x128xf32>
    %10 = arith.mulf %9, %8 : vector<16x128xf32>
    %cst_7 = arith.constant 0.707106769 : f32
    %11 = vector.broadcast %cst_7 : f32 to vector<16x128xf32>
    %12 = arith.mulf %8, %11 : vector<16x128xf32>
    %13 = math.erf %12 : vector<16x128xf32>
    %cst_8 = arith.constant 1.000000e+00 : f32
    %14 = vector.broadcast %cst_8 : f32 to vector<16x128xf32>
    %15 = arith.addf %14, %13 : vector<16x128xf32>
    %16 = arith.mulf %10, %15 : vector<16x128xf32>
    %c0_9 = arith.constant 0 : index
    %c0_10 = arith.constant 0 : index
    %17 = vector.load %arg10[%c0_9, %c0_10] : memref<16x128xf32, #tpu.memory_space<vmem>>, vector<16x128xf32>
    %18 = arith.truncf %16 : vector<16x128xf32> to vector<16x128xbf16>
    %c0_11 = arith.constant 0 : index
    %c0_12 = arith.constant 0 : index
    %19 = vector.load %arg7[%c0_11, %c0_12] : memref<128x128xbf16, #tpu.memory_space<vmem>>, vector<128x128xbf16>
    %cst_13 = arith.constant dense<0.000000e+00> : vector<16x128xf32>
    %20 = tpu.matmul %18, %19, %cst_13 {dimension_numbers = #tpu.dot_dimension_numbers<[1], [0], [0], [1], [0, 0, 1, 1], [], []>} : vector<16x128xbf16>, vector<128x128xbf16>, vector<16x128xf32> -> vector<16x128xf32>
    %21 = arith.addf %17, %20 : vector<16x128xf32>
    %c0_14 = arith.constant 0 : index
    %c0_15 = arith.constant 0 : index
    %22 = vector.load %arg10[%c0_14, %c0_15] : memref<16x128xf32, #tpu.memory_space<vmem>>, vector<16x128xf32>
    tpu.vector_store %arg10[%c0_14, %c0_15], %21 {strides = array<i32>} : memref<16x128xf32, #tpu.memory_space<vmem>>, vector<16x128xf32>,
    %c0_i32_16 = arith.constant 0 : i32
    %23 = arith.cmpi eq, %arg1, %c0_i32_16 : i32
    %24 = arith.extui %23 : i1 to i32
    %c0_i32_17 = arith.constant 0 : i32
    %25 = arith.cmpi ne, %24, %c0_i32_17 : i32
    scf.if %25 {
      %c0_18 = arith.constant 0 : index
      %c0_19 = arith.constant 0 : index
      %26 = vector.load %arg10[%c0_18, %c0_19] : memref<16x128xf32, #tpu.memory_space<vmem>>, vector<16x128xf32>
      %c0_20 = arith.constant 0 : index
      %c0_21 = arith.constant 0 : index
      %27 = vector.load %arg8[%c0_20, %c0_21] : memref<1x128xf32, #tpu.memory_space<vmem>>, vector<1x128xf32>
      %28 = vector.broadcast %27 : vector<1x128xf32> to vector<16x128xf32>
      %29 = arith.addf %26, %28 : vector<16x128xf32>
      %c0_22 = arith.constant 0 : index
      %c0_23 = arith.constant 0 : index
      %30 = vector.load %arg2[%c0_22, %c0_23] : memref<16x128xf32, #tpu.memory_space<vmem>>, vector<16x128xf32>
      %31 = arith.addf %29, %30 : vector<16x128xf32>
      %c0_24 = arith.constant 0 : index
      %c0_25 = arith.constant 0 : index
      %32 = vector.load %arg9[%c0_24, %c0_25] : memref<16x128xf32, #tpu.memory_space<vmem>>, vector<16x128xf32>
      tpu.vector_store %arg9[%c0_24, %c0_25], %31 {strides = array<i32>} : memref<16x128xf32, #tpu.memory_space<vmem>>, vector<16x128xf32>,
    } else {
    }
    return
  }
  func.func @transform_0(%arg0: i32, %arg1: i32) -> (i32, i32) {
    %c0_i32 = arith.constant 0 : i32
    %c0_i32_0 = arith.constant 0 : i32
    return %arg0, %c0_i32 : i32, i32
  }
  func.func @transform_1(%arg0: i32, %arg1: i32) -> (i32, i32) {
    %c0_i32 = arith.constant 0 : i32
    %c0_i32_0 = arith.constant 0 : i32
    %c0_i32_1 = arith.constant 0 : i32
    return %c0_i32, %c0_i32_0 : i32, i32
  }
  func.func @transform_2(%arg0: i32, %arg1: i32) -> (i32, i32) {
    %c0_i32 = arith.constant 0 : i32
    %c0_i32_0 = arith.constant 0 : i32
    %c0_i32_1 = arith.constant 0 : i32
    return %c0_i32, %c0_i32_0 : i32, i32
  }
  func.func @transform_3(%arg0: i32, %arg1: i32) -> (i32, i32) {
    %c0_i32 = arith.constant 0 : i32
    %c0_i32_0 = arith.constant 0 : i32
    return %c0_i32, %arg1 : i32, i32
  }
  func.func @transform_4(%arg0: i32, %arg1: i32) -> (i32, i32) {
    %c0_i32 = arith.constant 0 : i32
    %c0_i32_0 = arith.constant 0 : i32
    return %c0_i32, %arg1 : i32, i32
  }
  func.func @transform_5(%arg0: i32, %arg1: i32) -> (i32, i32) {
    %c0_i32 = arith.constant 0 : i32
    %c0_i32_0 = arith.constant 0 : i32
    return %arg1, %c0_i32 : i32, i32
  }
  func.func @transform_6(%arg0: i32, %arg1: i32) -> (i32, i32) {
    %c0_i32 = arith.constant 0 : i32
    %c0_i32_0 = arith.constant 0 : i32
    %c0_i32_1 = arith.constant 0 : i32
    return %c0_i32, %c0_i32_0 : i32, i32
  }
  func.func @transform_7(%arg0: i32, %arg1: i32) -> (i32, i32) {
    %c0_i32 = arith.constant 0 : i32
    %c0_i32_0 = arith.constant 0 : i32
    return %arg0, %c0_i32 : i32, i32
  }
}

module attributes {stable_mosaic.version = 11 : i64} {
  func.func @_mlp_kernel(%arg0: i32, %arg1: i32, %arg2: memref<16x128xf32, #tpu.memory_space<vmem>>, %arg3: memref<1x128xf32, #tpu.memory_space<vmem>>, %arg4: memref<1x128xf32, #tpu.memory_space<vmem>>, %arg5: memref<128x128xbf16, #tpu.memory_space<vmem>>, %arg6: memref<1x128xf32, #tpu.memory_space<vmem>>, %arg7: memref<128x128xbf16, #tpu.memory_space<vmem>>, %arg8: memref<1x128xf32, #tpu.memory_space<vmem>>, %arg9: memref<16x128xf32, #tpu.memory_space<vmem>>, %arg10: memref<16x128xf32, #tpu.memory_space<vmem>>, %arg11: memref<16x128xbf16, #tpu.memory_space<vmem>>) attributes {dimension_semantics = [#tpu.dimension_semantics<parallel>, #tpu.dimension_semantics<arbitrary>], iteration_bounds = array<i64: 1, 1>, scalar_prefetch = 0 : i64, scratch_operands = 2 : i64, tpu.core_type = #tpu.core_type<tc>, window_params = [{transform_indices = @transform_0, window_bounds = array<i64: 16, 128>}, {pipeline_mode = #tpu.pipeline_mode<synchronous>, transform_indices = @transform_1, window_bounds = array<i64: 1, 128>}, {pipeline_mode = #tpu.pipeline_mode<synchronous>, transform_indices = @transform_2, window_bounds = array<i64: 1, 128>}, {transform_indices = @transform_3, window_bounds = array<i64: 128, 128>}, {transform_indices = @transform_4, window_bounds = array<i64: 1, 128>}, {transform_indices = @transform_5, window_bounds = array<i64: 128, 128>}, {pipeline_mode = #tpu.pipeline_mode<synchronous>, transform_indices = @transform_6, window_bounds = array<i64: 1, 128>}, {transform_indices = @transform_7, window_bounds = array<i64: 16, 128>}]} {
    %c0_i32 = arith.constant 0 : i32
    %0 = arith.cmpi eq, %arg1, %c0_i32 : i32
    %1 = arith.extui %0 : i1 to i32
    %c0_i32_0 = arith.constant 0 : i32
    %2 = arith.cmpi ne, %1, %c0_i32_0 : i32
    scf.if %2 {
      %c0_18 = arith.constant 0 : index
      %c0_19 = arith.constant 0 : index
      %26 = vector.load %arg2[%c0_18, %c0_19] : memref<16x128xf32, #tpu.memory_space<vmem>>, vector<16x128xf32>
      %cst_20 = arith.constant dense<0.000000e+00> : vector<16xf32>
      %27 = vector.multi_reduction <add>, %26, %cst_20 [1] : vector<16x128xf32> to vector<16xf32>
      %28 = vector.shape_cast %27 : vector<16xf32> to vector<16x1xf32>
      %cst_21 = arith.constant 3.125000e-02 : f32
      %29 = vector.broadcast %cst_21 : f32 to vector<16x1xf32>
      %30 = arith.mulf %28, %29 : vector<16x1xf32>
      %31 = vector.broadcast %30 : vector<16x1xf32> to vector<16x128xf32>
      %32 = arith.subf %26, %31 : vector<16x128xf32>
      %33 = tpu.iota {dimensions = array<i32: 1>} : vector<16x128xi32>
      %c32_i32 = arith.constant 32 : i32
      %34 = vector.broadcast %c32_i32 : i32 to vector<16x128xi32>
      %35 = arith.cmpi slt, %33, %34 : vector<16x128xi32>
      %cst_22 = arith.constant 0.000000e+00 : f32
      %36 = vector.broadcast %cst_22 : f32 to vector<16x128xf32>
      %37 = arith.select %35, %32, %36 : vector<16x128xi1>, vector<16x128xf32>
      %38 = arith.mulf %37, %37 : vector<16x128xf32>
      %cst_23 = arith.constant dense<0.000000e+00> : vector<16xf32>
      %39 = vector.multi_reduction <add>, %38, %cst_23 [1] : vector<16x128xf32> to vector<16xf32>
      %40 = vector.shape_cast %39 : vector<16xf32> to vector<16x1xf32>
      %cst_24 = arith.constant 3.125000e-02 : f32
      %41 = vector.broadcast %cst_24 : f32 to vector<16x1xf32>
      %42 = arith.mulf %40, %41 : vector<16x1xf32>
      %cst_25 = arith.constant 9.99999974E-6 : f32
      %43 = vector.broadcast %cst_25 : f32 to vector<16x1xf32>
      %44 = arith.addf %42, %43 : vector<16x1xf32>
      %45 = math.rsqrt %44 : vector<16x1xf32>
      %46 = vector.broadcast %45 : vector<16x1xf32> to vector<16x128xf32>
      %47 = arith.mulf %32, %46 : vector<16x128xf32>
      %c0_26 = arith.constant 0 : index
      %c0_27 = arith.constant 0 : index
      %48 = vector.load %arg3[%c0_26, %c0_27] : memref<1x128xf32, #tpu.memory_space<vmem>>, vector<1x128xf32>
      %49 = vector.broadcast %48 : vector<1x128xf32> to vector<16x128xf32>
      %50 = arith.mulf %47, %49 : vector<16x128xf32>
      %c0_28 = arith.constant 0 : index
      %c0_29 = arith.constant 0 : index
      %51 = vector.load %arg4[%c0_28, %c0_29] : memref<1x128xf32, #tpu.memory_space<vmem>>, vector<1x128xf32>
      %52 = vector.broadcast %51 : vector<1x128xf32> to vector<16x128xf32>
      %53 = arith.addf %50, %52 : vector<16x128xf32>
      %54 = arith.truncf %53 : vector<16x128xf32> to vector<16x128xbf16>
      %c0_30 = arith.constant 0 : index
      %c0_31 = arith.constant 0 : index
      %55 = vector.load %arg11[%c0_30, %c0_31] : memref<16x128xbf16, #tpu.memory_space<vmem>>, vector<16x128xbf16>
      tpu.vector_store %arg11[%c0_30, %c0_31], %54 {strides = array<i32>} : memref<16x128xbf16, #tpu.memory_space<vmem>>, vector<16x128xbf16>,
      %cst_32 = arith.constant 0.000000e+00 : f32
      %56 = vector.broadcast %cst_32 : f32 to vector<16x128xf32>
      %c0_33 = arith.constant 0 : index
      %c0_34 = arith.constant 0 : index
      %57 = vector.load %arg10[%c0_33, %c0_34] : memref<16x128xf32, #tpu.memory_space<vmem>>, vector<16x128xf32>
      tpu.vector_store %arg10[%c0_33, %c0_34], %56 {strides = array<i32>} : memref<16x128xf32, #tpu.memory_space<vmem>>, vector<16x128xf32>,
    } else {
    }
    %c0 = arith.constant 0 : index
    %c0_1 = arith.constant 0 : index
    %3 = vector.load %arg11[%c0, %c0_1] : memref<16x128xbf16, #tpu.memory_space<vmem>>, vector<16x128xbf16>
    %c0_2 = arith.constant 0 : index
    %c0_3 = arith.constant 0 : index
    %4 = vector.load %arg5[%c0_2, %c0_3] : memref<128x128xbf16, #tpu.memory_space<vmem>>, vector<128x128xbf16>
    %cst = arith.constant dense<0.000000e+00> : vector<16x128xf32>
    %5 = tpu.matmul %3, %4, %cst {dimension_numbers = #tpu.dot_dimension_numbers<[1], [0], [0], [1], [0, 0, 1, 1], [], []>} : vector<16x128xbf16>, vector<128x128xbf16>, vector<16x128xf32> -> vector<16x128xf32>
    %c0_4 = arith.constant 0 : index
    %c0_5 = arith.constant 0 : index
    %6 = vector.load %arg6[%c0_4, %c0_5] : memref<1x128xf32, #tpu.memory_space<vmem>>, vector<1x128xf32>
    %7 = vector.broadcast %6 : vector<1x128xf32> to vector<16x128xf32>
    %8 = arith.addf %5, %7 : vector<16x128xf32>
    %cst_6 = arith.constant 5.000000e-01 : f32
    %9 = vector.broadcast %cst_6 : f32 to vector<16x128xf32>
    %10 = arith.mulf %9, %8 : vector<16x128xf32>
    %cst_7 = arith.constant 0.707106769 : f32
    %11 = vector.broadcast %cst_7 : f32 to vector<16x128xf32>
    %12 = arith.mulf %8, %11 : vector<16x128xf32>
    %13 = math.erf %12 : vector<16x128xf32>
    %cst_8 = arith.constant 1.000000e+00 : f32
    %14 = vector.broadcast %cst_8 : f32 to vector<16x128xf32>
    %15 = arith.addf %14, %13 : vector<16x128xf32>
    %16 = arith.mulf %10, %15 : vector<16x128xf32>
    %c0_9 = arith.constant 0 : index
    %c0_10 = arith.constant 0 : index
    %17 = vector.load %arg10[%c0_9, %c0_10] : memref<16x128xf32, #tpu.memory_space<vmem>>, vector<16x128xf32>
    %18 = arith.truncf %16 : vector<16x128xf32> to vector<16x128xbf16>
    %c0_11 = arith.constant 0 : index
    %c0_12 = arith.constant 0 : index
    %19 = vector.load %arg7[%c0_11, %c0_12] : memref<128x128xbf16, #tpu.memory_space<vmem>>, vector<128x128xbf16>
    %cst_13 = arith.constant dense<0.000000e+00> : vector<16x128xf32>
    %20 = tpu.matmul %18, %19, %cst_13 {dimension_numbers = #tpu.dot_dimension_numbers<[1], [0], [0], [1], [0, 0, 1, 1], [], []>} : vector<16x128xbf16>, vector<128x128xbf16>, vector<16x128xf32> -> vector<16x128xf32>
    %21 = arith.addf %17, %20 : vector<16x128xf32>
    %c0_14 = arith.constant 0 : index
    %c0_15 = arith.constant 0 : index
    %22 = vector.load %arg10[%c0_14, %c0_15] : memref<16x128xf32, #tpu.memory_space<vmem>>, vector<16x128xf32>
    tpu.vector_store %arg10[%c0_14, %c0_15], %21 {strides = array<i32>} : memref<16x128xf32, #tpu.memory_space<vmem>>, vector<16x128xf32>,
    %c0_i32_16 = arith.constant 0 : i32
    %23 = arith.cmpi eq, %arg1, %c0_i32_16 : i32
    %24 = arith.extui %23 : i1 to i32
    %c0_i32_17 = arith.constant 0 : i32
    %25 = arith.cmpi ne, %24, %c0_i32_17 : i32
    scf.if %25 {
      %c0_18 = arith.constant 0 : index
      %c0_19 = arith.constant 0 : index
      %26 = vector.load %arg10[%c0_18, %c0_19] : memref<16x128xf32, #tpu.memory_space<vmem>>, vector<16x128xf32>
      %c0_20 = arith.constant 0 : index
      %c0_21 = arith.constant 0 : index
      %27 = vector.load %arg8[%c0_20, %c0_21] : memref<1x128xf32, #tpu.memory_space<vmem>>, vector<1x128xf32>
      %28 = vector.broadcast %27 : vector<1x128xf32> to vector<16x128xf32>
      %29 = arith.addf %26, %28 : vector<16x128xf32>
      %c0_22 = arith.constant 0 : index
      %c0_23 = arith.constant 0 : index
      %30 = vector.load %arg2[%c0_22, %c0_23] : memref<16x128xf32, #tpu.memory_space<vmem>>, vector<16x128xf32>
      %31 = arith.addf %29, %30 : vector<16x128xf32>
      %c0_24 = arith.constant 0 : index
      %c0_25 = arith.constant 0 : index
      %32 = vector.load %arg9[%c0_24, %c0_25] : memref<16x128xf32, #tpu.memory_space<vmem>>, vector<16x128xf32>
      tpu.vector_store %arg9[%c0_24, %c0_25], %31 {strides = array<i32>} : memref<16x128xf32, #tpu.memory_space<vmem>>, vector<16x128xf32>,
    } else {
    }
    return
  }
  func.func @transform_0(%arg0: i32, %arg1: i32) -> (i32, i32) {
    %c0_i32 = arith.constant 0 : i32
    %c0_i32_0 = arith.constant 0 : i32
    return %arg0, %c0_i32 : i32, i32
  }
  func.func @transform_1(%arg0: i32, %arg1: i32) -> (i32, i32) {
    %c0_i32 = arith.constant 0 : i32
    %c0_i32_0 = arith.constant 0 : i32
    %c0_i32_1 = arith.constant 0 : i32
    return %c0_i32, %c0_i32_0 : i32, i32
  }
  func.func @transform_2(%arg0: i32, %arg1: i32) -> (i32, i32) {
    %c0_i32 = arith.constant 0 : i32
    %c0_i32_0 = arith.constant 0 : i32
    %c0_i32_1 = arith.constant 0 : i32
    return %c0_i32, %c0_i32_0 : i32, i32
  }
  func.func @transform_3(%arg0: i32, %arg1: i32) -> (i32, i32) {
    %c0_i32 = arith.constant 0 : i32
    %c0_i32_0 = arith.constant 0 : i32
    return %c0_i32, %arg1 : i32, i32
  }
  func.func @transform_4(%arg0: i32, %arg1: i32) -> (i32, i32) {
    %c0_i32 = arith.constant 0 : i32
    %c0_i32_0 = arith.constant 0 : i32
    return %c0_i32, %arg1 : i32, i32
  }
  func.func @transform_5(%arg0: i32, %arg1: i32) -> (i32, i32) {
    %c0_i32 = arith.constant 0 : i32
    %c0_i32_0 = arith.constant 0 : i32
    return %arg1, %c0_i32 : i32, i32
  }
  func.func @transform_6(%arg0: i32, %arg1: i32) -> (i32, i32) {
    %c0_i32 = arith.constant 0 : i32
    %c0_i32_0 = arith.constant 0 : i32
    %c0_i32_1 = arith.constant 0 : i32
    return %c0_i32, %c0_i32_0 : i32, i32
  }
  func.func @transform_7(%arg0: i32, %arg1: i32) -> (i32, i32) {
    %c0_i32 = arith.constant 0 : i32
    %c0_i32_0 = arith.constant 0 : i32
    return %arg0, %c0_i32 : i32, i32
  }
}

</mosaic_0001>

<bundles_post_ra>
// kernel: tpu_custom_call.1
= control target key start
LH: loop header
LB: loop body
LE: loop exit
PB: predicated region body
PF: predicated region fallthrough
CT: control target
= control target key end

     0   :  { %12 = vsyncpa [#allocation5], 0  ;;  %s753_s0 = inlined_call_operand.hbm [shape: f32[16,128], index: 0, kind: input, shape index: {}]   ;;  %s754_s1 = inlined_call_operand.vmem [shape: f32[1,128], index: 1, kind: input, shape index: {}]   ;;  %s755_s2 = inlined_call_operand.vmem [shape: f32[1,128], index: 2, kind: input, shape index: {}]   ;;  %s756_s3 = inlined_call_operand.hbm [shape: bf16[128,128], index: 3, kind: input, shape index: {}]   ;;  %s757_s4 = inlined_call_operand.vmem [shape: f32[1,128], index: 4, kind: input, shape index: {}]   ;;  %s758_s5 = inlined_call_operand.hbm [shape: bf16[128,128], index: 5, kind: input, shape index: {}]   ;;  %s759_s6 = inlined_call_operand.vmem [shape: f32[1,128], index: 6, kind: input, shape index: {}]   ;;  %s760_s7 = inlined_call_operand.hbm [shape: f32[16,128], index: 7, kind: output, shape index: {}]  }
   0x1   :  { %13 = vsyncpa [#allocation8], 0 }
   0x2   :  { %14 = vsyncpa [#allocation6], 0  ;;  %s603_s24 = smov [#allocation7]   ;;  %s509_s28 = scalar_lea.hbm %s756_s3, 1024 }
   0x3   :  { %s36_s25 = sshll.u32 %s603_s24, 4  ;;  %p510_p0 = scmp.ne.s32.totalorder %s756_s3, %s509_s28  ;;  %s37_s25 = int_to_ptr.vmem [resolvable:$true] %s36_s25 }
   0x4   :  { %p513_p1 = scmp.lt.u32.totalorder %s509_s28, %s756_s3 }
   0x6   :  { %p515_p2 = pnand %p513_p1, %p510_p0 }
   0x8   :  { %518 = shalt.err (!%p515_p2)
}
   0x9   :  { %s519_s10 = scalar_lea.vmem %s37_s25, 1024  ;;  %p524_p4 = scmp.lt.s32.totalorder %s37_s25, %s37_s25 }
   0xa   :  { %p520_p3 = scmp.ne.s32.totalorder %s37_s25, %s519_s10  ;;  %p525_p5 = scmp.lt.s32.totalorder %s519_s10, %s519_s10 }
   0xc   :  { %p526_p6 = por %p525_p5, %p524_p4 }
   0xe   :  { %p527_p7 = pnand %p526_p6, %p520_p3 }
  0x10   :  { %530 = shalt.err (!%p527_p7)
}
  0x11   :  { %s604_s11 = smov 64   ;;  %s605_s12 = smov 4  }
  0x12   :  { %42 = dma.hbm_to_vmem [thread:$0]  %s756_s3, 1024, %s37_s25, [#allocation8], %s604_s11, %s604_s11, %s605_s12  }
  0x13   :  { %s606_s15 = smov [#allocation4]   ;;  %s531_s19 = scalar_lea.hbm %s753_s0, 256 }
  0x14   :  { %s20_s16 = sshll.u32 %s606_s15, 4  ;;  %p532_p8 = scmp.ne.s32.totalorder %s753_s0, %s531_s19  ;;  %s21_s16 = int_to_ptr.vmem [resolvable:$true] %s20_s16 }
  0x15   :  { %p535_p9 = scmp.lt.u32.totalorder %s531_s19, %s753_s0 }
  0x17   :  { %p537_p10 = pnand %p535_p9, %p532_p8 }
  0x19   :  { %540 = shalt.err (!%p537_p10)
}
  0x1a   :  { %s541_s24 = scalar_lea.vmem %s21_s16, 256  ;;  %p546_p12 = scmp.lt.s32.totalorder %s21_s16, %s21_s16 }
  0x1b   :  { %p542_p11 = scmp.ne.s32.totalorder %s21_s16, %s541_s24  ;;  %p547_p13 = scmp.lt.s32.totalorder %s541_s24, %s541_s24 }
  0x1d   :  { %p548_p0 = por %p547_p13, %p546_p12 }
  0x1f   :  { %p549_p1 = pnand %p548_p0, %p542_p11 }
  0x21   :  { %552 = shalt.err (!%p549_p1)
}
  0x22   :  { %s607_s3 = smov 128   ;;  %s608_s25 = smov 8  }
  0x23   :  { %26 = dma.hbm_to_vmem [thread:$0]  %s753_s0, 256, %s21_s16, [#allocation5], %s607_s3, %s607_s3, %s608_s25  }
  0x24   :  { %s609_s28 = smov [#allocation9]   ;;  %s553_s9 = scalar_lea.hbm %s758_s5, 1024 }
  0x25   :  { %s50_s29 = sshll.u32 %s609_s28, 4  ;;  %p554_p2 = scmp.ne.s32.totalorder %s758_s5, %s553_s9  ;;  %s51_s29 = int_to_ptr.vmem [resolvable:$true] %s50_s29 }
  0x26   :  { %p557_p3 = scmp.lt.u32.totalorder %s553_s9, %s758_s5 }
  0x28   :  { %p559_p4 = pnand %p557_p3, %p554_p2 }
  0x2a   :  { %562 = shalt.err (!%p559_p4)
}
  0x2b   :  { %s563_s17 = scalar_lea.vmem %s51_s29, 1024  ;;  %p568_p6 = scmp.lt.s32.totalorder %s51_s29, %s51_s29 }
  0x2c   :  { %p564_p5 = scmp.ne.s32.totalorder %s51_s29, %s563_s17  ;;  %p569_p7 = scmp.lt.s32.totalorder %s563_s17, %s563_s17 }
  0x2e   :  { %p570_p8 = por %p569_p7, %p568_p6 }
  0x30   :  { %p571_p9 = pnand %p570_p8, %p564_p5 }
  0x32   :  { %574 = shalt.err (!%p571_p9)
}
  0x33   :  { %56 = dma.hbm_to_vmem [thread:$0]  %s758_s5, 1024, %s51_s29, [#allocation8], %s604_s11, %s604_s11, %s605_s12  }
  0x34   :  { %597 = dma.done.wait [#allocation5], 256  }
  0x35   :  { %598 = vsyncadd [#allocation5], 4294967040 }
  0x36   :  { %599 = dma.done.wait [#allocation8], 2048  }
  0x37   :  { %600 = vsyncadd [#allocation8], 4294965248  ;;  %v698_v0 = vld [vmem:[#allocation4] sm:$0xff]  ;;  %v700_v1 = vld [vmem:[#allocation4 + $0x8] sm:$0xff]  ;;  %v610_v3 = vmov 0.0   ;;  %v83_v4 = vlaneseq  ;;  %vm611_vm1 = vmmov 0  }
  0x38   :  { %75 = vadd.xlane.f32.xlu0 %v698_v0  ;;  %v485_v2 = vld [vmem:[#allocation7] sm:$0xff]   ;;  %435 = vmatprep.subr.bf16.mxu0 %v610_v3  ;;  %v486_v16 = vld [vmem:[#allocation7 + $0x8] sm:$0xff]   ;;  %v487_v17 = vld [vmem:[#allocation7 + $0x10] sm:$0xff]   ;;  %s612_s20 = smov [#allocation10]  }
  0x39   :  { %455 = vmatprep.subr.bf16.mxu1 %v610_v3  ;;  %436 = vmatpush3.bf16.msra.mxu0 %v485_v2  ;;  %v84_v5 = vand.u32 127, %v83_v4  ;;  %v488_v18 = vld [vmem:[#allocation7 + $0x18] sm:$0xff]   ;;  %v489_v19 = vld [vmem:[#allocation7 + $0x20] sm:$0xff]   ;;  %v490_v20 = vld [vmem:[#allocation7 + $0x28] sm:$0xff]   ;;  %s384_s21 = sshll.u32 %s612_s20, 4  ;;  %s385_s21 = int_to_ptr.vmem [resolvable:$true] %s384_s21 }
  0x3a   :  { %437 = vmatprep.subr.bf16.mxu0 %v610_v3  ;;  %451 = vmatprep.mubr.msk.bf16.mxu0 %vm611_vm1, %v610_v3  ;;  %v491_v21 = vld [vmem:[#allocation7 + $0x30] sm:$0xff]   ;;  %v492_v22 = vld [vmem:[#allocation7 + $0x38] sm:$0xff]   ;;  %v493_v23 = vld [vmem:[#allocation9] sm:$0xff]   ;;  %s575_s22 = scalar_lea.vmem %s385_s21, 256  ;;  %p580_p11 = scmp.lt.s32.totalorder %s385_s21, %s385_s21 }
  0x3b   :  { %vm85_vm0 = vcmp.lt.s32.totalorder %v84_v5, 32  ;;  %471 = vmatprep.mubr.msk.bf16.mxu1 %vm611_vm1, %v610_v3  ;;  %456 = vmatpush3.bf16.msra.mxu1 %v493_v23  ;;  %v494_v24 = vld [vmem:[#allocation9 + $0x8] sm:$0xff]   ;;  %v397_v33 = vld [vmem:[%s754_s1] ss:$0 sm:$0xff]  ;;  %v496_v43 = vld [vmem:[#allocation9 + $0x18] sm:$0xff]   ;;  %p576_p10 = scmp.ne.s32.totalorder %s385_s21, %s575_s22  ;;  %p581_p12 = scmp.lt.s32.totalorder %s575_s22, %s575_s22 }
  0x3c   :  { %77 = vadd.xlane.f32.xlu0 %v700_v1  ;;  %457 = vmatprep.subr.bf16.mxu1 %v610_v3  ;;  %v398_v37 = vld [vmem:[%s755_s2] ss:$0 sm:$0xff]  ;;  %v497_v44 = vld [vmem:[#allocation9 + $0x20] sm:$0xff]   ;;  %v498_v45 = vld [vmem:[#allocation9 + $0x28] sm:$0xff]  }
  0x3d   :  { %438 = vmatpush3.bf16.msra.mxu0 %v486_v16  ;;  %v495_v42 = vld [vmem:[#allocation9 + $0x10] sm:$0xff]   ;;  %v500_v47 = vld [vmem:[#allocation9 + $0x38] sm:$0xff]   ;;  %p582_p13 = por %p581_p12, %p580_p11 }
  0x3e   :  { %439 = vmatprep.subr.bf16.mxu0 %v610_v3  ;;  %v499_v46 = vld [vmem:[#allocation9 + $0x30] sm:$0xff]  }
  0x3f   :  { %458 = vmatpush3.bf16.msra.mxu1 %v494_v24  ;;  %v399_v48 = vld [vmem:[%s757_s4] ss:$0 sm:$0xff]  ;;  %p583_p0 = pnand %p582_p13, %p576_p10 }
  0x40   :  { %459 = vmatprep.subr.bf16.mxu1 %v610_v3  ;;  %v416_v4 = vld [vmem:[%s759_s6] ss:$0 sm:$0xff] }
  0x41   :  { %440 = vmatpush3.bf16.msra.mxu0 %v487_v17 }
  0x42   :  { %441 = vmatprep.subr.bf16.mxu0 %v610_v3 }
  0x43   :  { %460 = vmatpush3.bf16.msra.mxu1 %v495_v42 }
  0x44   :  { %461 = vmatprep.subr.bf16.mxu1 %v610_v3 }
  0x45   :  { %442 = vmatpush3.bf16.msra.mxu0 %v488_v18 }
  0x46   :  { %443 = vmatprep.subr.bf16.mxu0 %v610_v3 }
  0x47   :  { %462 = vmatpush3.bf16.msra.mxu1 %v496_v43 }
  0x48   :  { %463 = vmatprep.subr.bf16.mxu1 %v610_v3 }
  0x49   :  { %444 = vmatpush3.bf16.msra.mxu0 %v489_v19 }
  0x4a   :  { %445 = vmatprep.subr.bf16.mxu0 %v610_v3 }
  0x4b   :  { %464 = vmatpush3.bf16.msra.mxu1 %v497_v44 }
  0x4c   :  { %465 = vmatprep.subr.bf16.mxu1 %v610_v3 }
  0x4d   :  { %446 = vmatpush3.bf16.msra.mxu0 %v490_v20 }
  0x4e   :  { %447 = vmatprep.subr.bf16.mxu0 %v610_v3 }
  0x4f   :  { %466 = vmatpush3.bf16.msra.mxu1 %v498_v45 }
  0x50   :  { %467 = vmatprep.subr.bf16.mxu1 %v610_v3 }
  0x51   :  { %448 = vmatpush3.bf16.msra.mxu0 %v491_v21 }
  0x52   :  { %449 = vmatprep.subr.bf16.mxu0 %v610_v3 }
  0x53   :  { %468 = vmatpush3.bf16.msra.mxu1 %v499_v46 }
  0x54   :  { %469 = vmatprep.subr.bf16.mxu1 %v610_v3 }
  0x55   :  { %450 = vmatpush3.bf16.msra.mxu0 %v492_v22 }
  0x57   :  { %470 = vmatpush3.bf16.msra.mxu1 %v500_v47 }
  0xc5   :  { %v76_v6 = vpop.xlane.xlu0 %75 }
  0xc6   :  { %v79_v7 = vmul.f32 0.03125, %v76_v6 }
  0xc8   :  { %v81_v8 = vsub.f32 %v698_v0, %v79_v7 }
  0xc9   :  { %v78_v9 = vpop.xlane.xlu0 %77 }
  0xca   :  { %v80_v10 = vmul.f32 0.03125, %v78_v9  ;;  %v86_v11 = vsel %vm85_vm0, %v81_v8, 0.0 }
  0xcb   :  { %v88_v12 = vmul.f32 %v86_v11, %v86_v11 }
  0xcc   :  { %v82_v13 = vsub.f32 %v700_v1, %v80_v10 }
  0xcd   :  { %90 = vadd.xlane.f32.xlu1 %v88_v12 }
  0xce   :  { %v87_v14 = vsel %vm85_vm0, %v82_v13, 0.0 }
  0xcf   :  { %v89_v15 = vmul.f32 %v87_v14, %v87_v14 }
  0xd1   :  { %92 = vadd.xlane.f32.xlu1 %v89_v15 }
 0x15a   :  { %v91_v25 = vpop.xlane.xlu1 %90 }
 0x15b   :  { %v94_v26 = vmul.f32 0.03125, %v91_v25 }
 0x15d   :  { %v96_v27 = vadd.f32 1e-05, %v94_v26 }
 0x15e   :  { %v93_v28 = vpop.xlane.xlu1 %92 }
 0x15f   :  { %501 = vrsqrt.f32 %v96_v27  ;;  %v95_v29 = vmul.f32 0.03125, %v93_v28 }
 0x161   :  { %v97_v30 = vadd.f32 1e-05, %v95_v29 }
 0x163   :  { %503 = vrsqrt.f32 %v97_v30 }
 0x169   :  { %v502_v31 = vpop.eup %501 }
 0x16a   :  { %v100_v32 = vmul.f32 %v502_v31, %v81_v8 }
 0x16c   :  { %v109_v36 = vmul.f32 %v397_v33, %v100_v32 }
 0x16d   :  { %v504_v34 = vpop.eup %503 }
 0x16e   :  { %v101_v35 = vmul.f32 %v504_v34, %v82_v13  ;;  %v118_v39 = vadd.f32 %v398_v37, %v109_v36 }
 0x170   :  { %v110_v38 = vmul.f32 %v397_v33, %v101_v35 }
 0x172   :  { %v119_v40 = vadd.f32 %v398_v37, %v110_v38 }
 0x174   :  { %v120_v41 = vpack.c.bf16 %v119_v40, %v118_v39 }
 0x176   :  { %452 = vmatmul.mubr.bf16.vlgmr.msra.gmra.mrb[0].mxu0 %v120_v41 }
 0x249   :  { %v230_v49 = vpop.f32.mrb[0].mxu0 }
 0x24a   :  { %v231_v50 = vadd.f32 %v399_v48, %v230_v49  ;;  %v453_v51 = vpop.f32.mrb[1].mxu0 }
 0x24b   :  { %v233_v52 = vpop.f32.mrb[2].mxu0 }
 0x24c   :  { %v239_v53 = vmul.f32 0.70710677, %v231_v50  ;;  %v234_v54 = vadd.f32 %v399_v48, %v233_v52  ;;  %v454_v55 = vpop.f32.mrb[3].mxu0  ;;  %v237_v60 = vmul.f32 0.5, %v231_v50 }
 0x24e   :  { %505 = verf.f32 %v239_v53  ;;  %v240_v56 = vmul.f32 0.70710677, %v234_v54  ;;  %v238_v61 = vmul.f32 0.5, %v234_v54 }
 0x250   :  { %507 = verf.f32 %v240_v56 }
 0x258   :  { %v506_v57 = vpop.eup %505 }
 0x259   :  { %v243_v58 = vadd.f32 1.0, %v506_v57 }
 0x25a   :  { %v508_v59 = vpop.eup %507 }
 0x25b   :  { %v244_v62 = vadd.f32 1.0, %v508_v59  ;;  %v245_v63 = vmul.f32 %v243_v58, %v237_v60 }
 0x25d   :  { %v246_v2 = vmul.f32 %v244_v62, %v238_v61 }
 0x25f   :  { %v249_v3 = vpack.c.bf16 %v246_v2, %v245_v63 }
 0x261   :  { %472 = vmatmul.mubr.bf16.vlgmr.msra.gmra.mrb[0].mxu1 %v249_v3 }
 0x334   :  { %v348_v5 = vpop.f32.mrb[0].mxu1 }
 0x335   :  { %v371_v6 = vadd.f32 %v416_v4, %v348_v5  ;;  %v473_v7 = vpop.f32.mrb[1].mxu1 }
 0x336   :  { %v351_v8 = vpop.f32.mrb[2].mxu1 }
 0x337   :  { %v375_v9 = vadd.f32 %v371_v6, %v698_v0  ;;  %v372_v10 = vadd.f32 %v416_v4, %v351_v8  ;;  %v474_v11 = vpop.f32.mrb[3].mxu1 }
 0x339   :  { %377 = vst [vmem:[#allocation10] sm:$0xff] %v375_v9  ;;  %v376_v12 = vadd.f32 %v372_v10, %v700_v1 }
 0x33b   :  { %378 = vst [vmem:[#allocation10 + $0x8] sm:$0xff] %v376_v12 }
 0x33c   :  { %586 = shalt.err (!%p583_p0)
}
 0x33d   :  { %s587_s24 = scalar_lea.hbm %s760_s7, 256 }
 0x33e   :  { %p588_p1 = scmp.ne.s32.totalorder %s760_s7, %s587_s24  ;;  %p591_p2 = scmp.lt.u32.totalorder %s587_s24, %s760_s7 }
 0x340   :  { %p593_p3 = pnand %p591_p2, %p588_p1 }
 0x342   :  { %596 = shalt.err (!%p593_p3)
}
 0x343   :  { %390 = dma.vmem_to_hbm [thread:$0]  %s385_s21, 256, %s760_s7, [#allocation6], %s607_s3, %s607_s3, %s608_s25  }
 0x344   :  { %601 = dma.done.wait [#allocation6], 256  }
 0x345   :  { %602 = vsyncadd [#allocation6], 4294967040 }
 0x346   :  { %394 = vsyncpa [#allocation5], 1 }
 0x347   :  { %395 = vsyncpa [#allocation8], 1 }
 0x348   :  { %396 = vsyncpa [#allocation6], 1 }

// kernel: tpu_custom_call.1
= control target key start
LH: loop header
LB: loop body
LE: loop exit
PB: predicated region body
PF: predicated region fallthrough
CT: control target
= control target key end

     0   :  { %12 = vsyncpa [#allocation5], 0  ;;  %s753_s0 = inlined_call_operand.hbm [shape: f32[16,128], index: 0, kind: input, shape index: {}]   ;;  %s754_s1 = inlined_call_operand.vmem [shape: f32[1,128], index: 1, kind: input, shape index: {}]   ;;  %s755_s2 = inlined_call_operand.vmem [shape: f32[1,128], index: 2, kind: input, shape index: {}]   ;;  %s756_s3 = inlined_call_operand.hbm [shape: bf16[128,128], index: 3, kind: input, shape index: {}]   ;;  %s757_s4 = inlined_call_operand.vmem [shape: f32[1,128], index: 4, kind: input, shape index: {}]   ;;  %s758_s5 = inlined_call_operand.hbm [shape: bf16[128,128], index: 5, kind: input, shape index: {}]   ;;  %s759_s6 = inlined_call_operand.vmem [shape: f32[1,128], index: 6, kind: input, shape index: {}]   ;;  %s760_s7 = inlined_call_operand.hbm [shape: f32[16,128], index: 7, kind: output, shape index: {}]  }
   0x1   :  { %13 = vsyncpa [#allocation8], 0 }
   0x2   :  { %14 = vsyncpa [#allocation6], 0  ;;  %s603_s24 = smov [#allocation7]   ;;  %s509_s28 = scalar_lea.hbm %s756_s3, 1024 }
   0x3   :  { %s36_s25 = sshll.u32 %s603_s24, 4  ;;  %p510_p0 = scmp.ne.s32.totalorder %s756_s3, %s509_s28  ;;  %s37_s25 = int_to_ptr.vmem [resolvable:$true] %s36_s25 }
   0x4   :  { %p513_p1 = scmp.lt.u32.totalorder %s509_s28, %s756_s3 }
   0x6   :  { %p515_p2 = pnand %p513_p1, %p510_p0 }
   0x8   :  { %518 = shalt.err (!%p515_p2)
}
   0x9   :  { %s519_s10 = scalar_lea.vmem %s37_s25, 1024  ;;  %p524_p4 = scmp.lt.s32.totalorder %s37_s25, %s37_s25 }
   0xa   :  { %p520_p3 = scmp.ne.s32.totalorder %s37_s25, %s519_s10  ;;  %p525_p5 = scmp.lt.s32.totalorder %s519_s10, %s519_s10 }
   0xc   :  { %p526_p6 = por %p525_p5, %p524_p4 }
   0xe   :  { %p527_p7 = pnand %p526_p6, %p520_p3 }
  0x10   :  { %530 = shalt.err (!%p527_p7)
}
  0x11   :  { %s604_s11 = smov 64   ;;  %s605_s12 = smov 4  }
  0x12   :  { %42 = dma.hbm_to_vmem [thread:$0]  %s756_s3, 1024, %s37_s25, [#allocation8], %s604_s11, %s604_s11, %s605_s12  }
  0x13   :  { %s606_s15 = smov [#allocation4]   ;;  %s531_s19 = scalar_lea.hbm %s753_s0, 256 }
  0x14   :  { %s20_s16 = sshll.u32 %s606_s15, 4  ;;  %p532_p8 = scmp.ne.s32.totalorder %s753_s0, %s531_s19  ;;  %s21_s16 = int_to_ptr.vmem [resolvable:$true] %s20_s16 }
  0x15   :  { %p535_p9 = scmp.lt.u32.totalorder %s531_s19, %s753_s0 }
  0x17   :  { %p537_p10 = pnand %p535_p9, %p532_p8 }
  0x19   :  { %540 = shalt.err (!%p537_p10)
}
  0x1a   :  { %s541_s24 = scalar_lea.vmem %s21_s16, 256  ;;  %p546_p12 = scmp.lt.s32.totalorder %s21_s16, %s21_s16 }
  0x1b   :  { %p542_p11 = scmp.ne.s32.totalorder %s21_s16, %s541_s24  ;;  %p547_p13 = scmp.lt.s32.totalorder %s541_s24, %s541_s24 }
  0x1d   :  { %p548_p0 = por %p547_p13, %p546_p12 }
  0x1f   :  { %p549_p1 = pnand %p548_p0, %p542_p11 }
  0x21   :  { %552 = shalt.err (!%p549_p1)
}
  0x22   :  { %s607_s3 = smov 128   ;;  %s608_s25 = smov 8  }
  0x23   :  { %26 = dma.hbm_to_vmem [thread:$0]  %s753_s0, 256, %s21_s16, [#allocation5], %s607_s3, %s607_s3, %s608_s25  }
  0x24   :  { %s609_s28 = smov [#allocation9]   ;;  %s553_s9 = scalar_lea.hbm %s758_s5, 1024 }
  0x25   :  { %s50_s29 = sshll.u32 %s609_s28, 4  ;;  %p554_p2 = scmp.ne.s32.totalorder %s758_s5, %s553_s9  ;;  %s51_s29 = int_to_ptr.vmem [resolvable:$true] %s50_s29 }
  0x26   :  { %p557_p3 = scmp.lt.u32.totalorder %s553_s9, %s758_s5 }
  0x28   :  { %p559_p4 = pnand %p557_p3, %p554_p2 }
  0x2a   :  { %562 = shalt.err (!%p559_p4)
}
  0x2b   :  { %s563_s17 = scalar_lea.vmem %s51_s29, 1024  ;;  %p568_p6 = scmp.lt.s32.totalorder %s51_s29, %s51_s29 }
  0x2c   :  { %p564_p5 = scmp.ne.s32.totalorder %s51_s29, %s563_s17  ;;  %p569_p7 = scmp.lt.s32.totalorder %s563_s17, %s563_s17 }
  0x2e   :  { %p570_p8 = por %p569_p7, %p568_p6 }
  0x30   :  { %p571_p9 = pnand %p570_p8, %p564_p5 }
  0x32   :  { %574 = shalt.err (!%p571_p9)
}
  0x33   :  { %56 = dma.hbm_to_vmem [thread:$0]  %s758_s5, 1024, %s51_s29, [#allocation8], %s604_s11, %s604_s11, %s605_s12  }
  0x34   :  { %597 = dma.done.wait [#allocation5], 256  }
  0x35   :  { %598 = vsyncadd [#allocation5], 4294967040 }
  0x36   :  { %599 = dma.done.wait [#allocation8], 2048  }
  0x37   :  { %600 = vsyncadd [#allocation8], 4294965248  ;;  %v698_v0 = vld [vmem:[#allocation4] sm:$0xff]  ;;  %v700_v1 = vld [vmem:[#allocation4 + $0x8] sm:$0xff]  ;;  %v610_v3 = vmov 0.0   ;;  %v83_v4 = vlaneseq  ;;  %vm611_vm1 = vmmov 0  }
  0x38   :  { %75 = vadd.xlane.f32.xlu0 %v698_v0  ;;  %v485_v2 = vld [vmem:[#allocation7] sm:$0xff]   ;;  %435 = vmatprep.subr.bf16.mxu0 %v610_v3  ;;  %v486_v16 = vld [vmem:[#allocation7 + $0x8] sm:$0xff]   ;;  %v487_v17 = vld [vmem:[#allocation7 + $0x10] sm:$0xff]   ;;  %s612_s20 = smov [#allocation10]  }
  0x39   :  { %455 = vmatprep.subr.bf16.mxu1 %v610_v3  ;;  %436 = vmatpush3.bf16.msra.mxu0 %v485_v2  ;;  %v84_v5 = vand.u32 127, %v83_v4  ;;  %v488_v18 = vld [vmem:[#allocation7 + $0x18] sm:$0xff]   ;;  %v489_v19 = vld [vmem:[#allocation7 + $0x20] sm:$0xff]   ;;  %v490_v20 = vld [vmem:[#allocation7 + $0x28] sm:$0xff]   ;;  %s384_s21 = sshll.u32 %s612_s20, 4  ;;  %s385_s21 = int_to_ptr.vmem [resolvable:$true] %s384_s21 }
  0x3a   :  { %437 = vmatprep.subr.bf16.mxu0 %v610_v3  ;;  %451 = vmatprep.mubr.msk.bf16.mxu0 %vm611_vm1, %v610_v3  ;;  %v491_v21 = vld [vmem:[#allocation7 + $0x30] sm:$0xff]   ;;  %v492_v22 = vld [vmem:[#allocation7 + $0x38] sm:$0xff]   ;;  %v493_v23 = vld [vmem:[#allocation9] sm:$0xff]   ;;  %s575_s22 = scalar_lea.vmem %s385_s21, 256  ;;  %p580_p11 = scmp.lt.s32.totalorder %s385_s21, %s385_s21 }
  0x3b   :  { %vm85_vm0 = vcmp.lt.s32.totalorder %v84_v5, 32  ;;  %471 = vmatprep.mubr.msk.bf16.mxu1 %vm611_vm1, %v610_v3  ;;  %456 = vmatpush3.bf16.msra.mxu1 %v493_v23  ;;  %v494_v24 = vld [vmem:[#allocation9 + $0x8] sm:$0xff]   ;;  %v397_v33 = vld [vmem:[%s754_s1] ss:$0 sm:$0xff]  ;;  %v496_v43 = vld [vmem:[#allocation9 + $0x18] sm:$0xff]   ;;  %p576_p10 = scmp.ne.s32.totalorder %s385_s21, %s575_s22  ;;  %p581_p12 = scmp.lt.s32.totalorder %s575_s22, %s575_s22 }
  0x3c   :  { %77 = vadd.xlane.f32.xlu0 %v700_v1  ;;  %457 = vmatprep.subr.bf16.mxu1 %v610_v3  ;;  %v398_v37 = vld [vmem:[%s755_s2] ss:$0 sm:$0xff]  ;;  %v497_v44 = vld [vmem:[#allocation9 + $0x20] sm:$0xff]   ;;  %v498_v45 = vld [vmem:[#allocation9 + $0x28] sm:$0xff]  }
  0x3d   :  { %438 = vmatpush3.bf16.msra.mxu0 %v486_v16  ;;  %v495_v42 = vld [vmem:[#allocation9 + $0x10] sm:$0xff]   ;;  %v500_v47 = vld [vmem:[#allocation9 + $0x38] sm:$0xff]   ;;  %p582_p13 = por %p581_p12, %p580_p11 }
  0x3e   :  { %439 = vmatprep.subr.bf16.mxu0 %v610_v3  ;;  %v499_v46 = vld [vmem:[#allocation9 + $0x30] sm:$0xff]  }
  0x3f   :  { %458 = vmatpush3.bf16.msra.mxu1 %v494_v24  ;;  %v399_v48 = vld [vmem:[%s757_s4] ss:$0 sm:$0xff]  ;;  %p583_p0 = pnand %p582_p13, %p576_p10 }
  0x40   :  { %459 = vmatprep.subr.bf16.mxu1 %v610_v3  ;;  %v416_v4 = vld [vmem:[%s759_s6] ss:$0 sm:$0xff] }
  0x41   :  { %440 = vmatpush3.bf16.msra.mxu0 %v487_v17 }
  0x42   :  { %441 = vmatprep.subr.bf16.mxu0 %v610_v3 }
  0x43   :  { %460 = vmatpush3.bf16.msra.mxu1 %v495_v42 }
  0x44   :  { %461 = vmatprep.subr.bf16.mxu1 %v610_v3 }
  0x45   :  { %442 = vmatpush3.bf16.msra.mxu0 %v488_v18 }
  0x46   :  { %443 = vmatprep.subr.bf16.mxu0 %v610_v3 }
  0x47   :  { %462 = vmatpush3.bf16.msra.mxu1 %v496_v43 }
  0x48   :  { %463 = vmatprep.subr.bf16.mxu1 %v610_v3 }
  0x49   :  { %444 = vmatpush3.bf16.msra.mxu0 %v489_v19 }
  0x4a   :  { %445 = vmatprep.subr.bf16.mxu0 %v610_v3 }
  0x4b   :  { %464 = vmatpush3.bf16.msra.mxu1 %v497_v44 }
  0x4c   :  { %465 = vmatprep.subr.bf16.mxu1 %v610_v3 }
  0x4d   :  { %446 = vmatpush3.bf16.msra.mxu0 %v490_v20 }
  0x4e   :  { %447 = vmatprep.subr.bf16.mxu0 %v610_v3 }
  0x4f   :  { %466 = vmatpush3.bf16.msra.mxu1 %v498_v45 }
  0x50   :  { %467 = vmatprep.subr.bf16.mxu1 %v610_v3 }
  0x51   :  { %448 = vmatpush3.bf16.msra.mxu0 %v491_v21 }
  0x52   :  { %449 = vmatprep.subr.bf16.mxu0 %v610_v3 }
  0x53   :  { %468 = vmatpush3.bf16.msra.mxu1 %v499_v46 }
  0x54   :  { %469 = vmatprep.subr.bf16.mxu1 %v610_v3 }
  0x55   :  { %450 = vmatpush3.bf16.msra.mxu0 %v492_v22 }
  0x57   :  { %470 = vmatpush3.bf16.msra.mxu1 %v500_v47 }
  0xc5   :  { %v76_v6 = vpop.xlane.xlu0 %75 }
  0xc6   :  { %v79_v7 = vmul.f32 0.03125, %v76_v6 }
  0xc8   :  { %v81_v8 = vsub.f32 %v698_v0, %v79_v7 }
  0xc9   :  { %v78_v9 = vpop.xlane.xlu0 %77 }
  0xca   :  { %v80_v10 = vmul.f32 0.03125, %v78_v9  ;;  %v86_v11 = vsel %vm85_vm0, %v81_v8, 0.0 }
  0xcb   :  { %v88_v12 = vmul.f32 %v86_v11, %v86_v11 }
  0xcc   :  { %v82_v13 = vsub.f32 %v700_v1, %v80_v10 }
  0xcd   :  { %90 = vadd.xlane.f32.xlu1 %v88_v12 }
  0xce   :  { %v87_v14 = vsel %vm85_vm0, %v82_v13, 0.0 }
  0xcf   :  { %v89_v15 = vmul.f32 %v87_v14, %v87_v14 }
  0xd1   :  { %92 = vadd.xlane.f32.xlu1 %v89_v15 }
 0x15a   :  { %v91_v25 = vpop.xlane.xlu1 %90 }
 0x15b   :  { %v94_v26 = vmul.f32 0.03125, %v91_v25 }
 0x15d   :  { %v96_v27 = vadd.f32 1e-05, %v94_v26 }
 0x15e   :  { %v93_v28 = vpop.xlane.xlu1 %92 }
 0x15f   :  { %501 = vrsqrt.f32 %v96_v27  ;;  %v95_v29 = vmul.f32 0.03125, %v93_v28 }
 0x161   :  { %v97_v30 = vadd.f32 1e-05, %v95_v29 }
 0x163   :  { %503 = vrsqrt.f32 %v97_v30 }
 0x169   :  { %v502_v31 = vpop.eup %501 }
 0x16a   :  { %v100_v32 = vmul.f32 %v502_v31, %v81_v8 }
 0x16c   :  { %v109_v36 = vmul.f32 %v397_v33, %v100_v32 }
 0x16d   :  { %v504_v34 = vpop.eup %503 }
 0x16e   :  { %v101_v35 = vmul.f32 %v504_v34, %v82_v13  ;;  %v118_v39 = vadd.f32 %v398_v37, %v109_v36 }
 0x170   :  { %v110_v38 = vmul.f32 %v397_v33, %v101_v35 }
 0x172   :  { %v119_v40 = vadd.f32 %v398_v37, %v110_v38 }
 0x174   :  { %v120_v41 = vpack.c.bf16 %v119_v40, %v118_v39 }
 0x176   :  { %452 = vmatmul.mubr.bf16.vlgmr.msra.gmra.mrb[0].mxu0 %v120_v41 }
 0x249   :  { %v230_v49 = vpop.f32.mrb[0].mxu0 }
 0x24a   :  { %v231_v50 = vadd.f32 %v399_v48, %v230_v49  ;;  %v453_v51 = vpop.f32.mrb[1].mxu0 }
 0x24b   :  { %v233_v52 = vpop.f32.mrb[2].mxu0 }
 0x24c   :  { %v239_v53 = vmul.f32 0.70710677, %v231_v50  ;;  %v234_v54 = vadd.f32 %v399_v48, %v233_v52  ;;  %v454_v55 = vpop.f32.mrb[3].mxu0  ;;  %v237_v60 = vmul.f32 0.5, %v231_v50 }
 0x24e   :  { %505 = verf.f32 %v239_v53  ;;  %v240_v56 = vmul.f32 0.70710677, %v234_v54  ;;  %v238_v61 = vmul.f32 0.5, %v234_v54 }
 0x250   :  { %507 = verf.f32 %v240_v56 }
 0x258   :  { %v506_v57 = vpop.eup %505 }
 0x259   :  { %v243_v58 = vadd.f32 1.0, %v506_v57 }
 0x25a   :  { %v508_v59 = vpop.eup %507 }
 0x25b   :  { %v244_v62 = vadd.f32 1.0, %v508_v59  ;;  %v245_v63 = vmul.f32 %v243_v58, %v237_v60 }
 0x25d   :  { %v246_v2 = vmul.f32 %v244_v62, %v238_v61 }
 0x25f   :  { %v249_v3 = vpack.c.bf16 %v246_v2, %v245_v63 }
 0x261   :  { %472 = vmatmul.mubr.bf16.vlgmr.msra.gmra.mrb[0].mxu1 %v249_v3 }
 0x334   :  { %v348_v5 = vpop.f32.mrb[0].mxu1 }
 0x335   :  { %v371_v6 = vadd.f32 %v416_v4, %v348_v5  ;;  %v473_v7 = vpop.f32.mrb[1].mxu1 }
 0x336   :  { %v351_v8 = vpop.f32.mrb[2].mxu1 }
 0x337   :  { %v375_v9 = vadd.f32 %v371_v6, %v698_v0  ;;  %v372_v10 = vadd.f32 %v416_v4, %v351_v8  ;;  %v474_v11 = vpop.f32.mrb[3].mxu1 }
 0x339   :  { %377 = vst [vmem:[#allocation10] sm:$0xff] %v375_v9  ;;  %v376_v12 = vadd.f32 %v372_v10, %v700_v1 }
 0x33b   :  { %378 = vst [vmem:[#allocation10 + $0x8] sm:$0xff] %v376_v12 }
 0x33c   :  { %586 = shalt.err (!%p583_p0)
}
 0x33d   :  { %s587_s24 = scalar_lea.hbm %s760_s7, 256 }
 0x33e   :  { %p588_p1 = scmp.ne.s32.totalorder %s760_s7, %s587_s24  ;;  %p591_p2 = scmp.lt.u32.totalorder %s587_s24, %s760_s7 }
 0x340   :  { %p593_p3 = pnand %p591_p2, %p588_p1 }
 0x342   :  { %596 = shalt.err (!%p593_p3)
}
 0x343   :  { %390 = dma.vmem_to_hbm [thread:$0]  %s385_s21, 256, %s760_s7, [#allocation6], %s607_s3, %s607_s3, %s608_s25  }
 0x344   :  { %601 = dma.done.wait [#allocation6], 256  }
 0x345   :  { %602 = vsyncadd [#allocation6], 4294967040 }
 0x346   :  { %394 = vsyncpa [#allocation5], 1 }
 0x347   :  { %395 = vsyncpa [#allocation8], 1 }
 0x348   :  { %396 = vsyncpa [#allocation6], 1 }

</bundles_post_ra>
